<compile_context>
chip_gen: v6e
topology: v6e:2x2x1
jax: 0.10.0
libtpu: 0.0.40
codegen_flags: <defaults>
</compile_context>

<pallas_src>
import functools
import math

import jax
import jax.numpy as jnp
from jax.experimental import pallas as pl
from jax.experimental.pallas import tpu as pltpu


def _round_up(x, m):
    return ((x + m - 1) // m) * m


def _vmem_budget_and_limit():
    """Generation-aware working-set budget and scoped-VMEM limit (bytes)."""
    cap = None
    try:
        info = pltpu.get_tpu_info()
        for name in ("vmem_capacity_bytes", "vmem_size_bytes", "vmem_bytes"):
            cap = getattr(info, name, None)
            if cap:
                break
    except Exception:
        cap = None
    if not cap:
        cap = 64 * 1024 * 1024          # conservative fallback: v7x per-TC VMEM
    cap = int(cap)
    budget = int(cap * 0.70)            # target for the pipelined working set
    limit = int(cap * 0.78)             # scoped-VMEM ceiling handed to Mosaic
    return budget, limit


def _choose_tiling(n, hid, budget_bytes, row_block=None, col_block=None):
    """Pick (bm, bk, n_pad): row block, contraction block, padded size.

    Working-set model (bytes); every streamed operand/output is counted as
    double-buffered (including the constant-index RHS):
      A block        2 * bm * bk * 2          (bf16)
      XW1/hid block  2 * bk * hid * 2         (bf16)
      outputs        2 * bm * hid * (4 + 2)   (f32 + bf16, pass 1 is the max)
      accumulator        bm * hid * 4         (f32 scratch)
    """

    def need(bm, bk):
        return (2 * bm * bk * 2 + 2 * bk * hid * 2
                + 2 * bm * hid * (4 + 2) + bm * hid * 4)

    if row_block is None:
        bm = min(512, _round_up(n, 256)) if n >= 256 else _round_up(n, 16)
        bm = min(bm, _round_up(n, 16))
        # keep >= 2 row blocks so both v7x TensorCores get work
        if _round_up(n, bm) // bm < 2 and bm >= 256:
            bm //= 2
    else:
        bm = row_block
    bm = max(16, (bm // 16) * 16)        # bf16 sublane tile is (16, 128)

    full = _round_up(n, bm)              # contraction length if fully resident

    if col_block is not None:
        bk = max(128, (col_block // 128) * 128)
    elif need(bm, full) <= budget_bytes:
        bk = full                        # whole contraction resident: 1 K step
    else:
        bk = 512                         # K-tile: grow while it still fits
        while 2 * bk < full and need(bm, 2 * bk) <= budget_bytes:
            bk *= 2
        while need(bm, bk) > budget_bytes and bm > 128:
            bm = max(128, ((bm // 2) // 16) * 16)
        while need(bm, bk) > budget_bytes and bk > 128:
            bk //= 2

    if bk >= full:
        bk = full
        n_pad = full
    else:
        n_pad = _round_up(n, math.lcm(bm, bk))
    return bm, bk, n_pad


# ------------------------------ Pallas kernels ------------------------------
def _pass1_kernel(a_ref, xw1_ref, hid_f32_ref, hid_bf16_ref, acc_ref):
    # acc += A[i, k] @ XW1[k, :]; at the last K step: hid = relu(acc).
    k = pl.program_id(1)

    @pl.when(k == 0)
    def _():
        acc_ref[...] = jnp.zeros_like(acc_ref)

    acc_ref[...] += jnp.dot(a_ref[...], xw1_ref[...],
                            preferred_element_type=jnp.float32)

    @pl.when(k == pl.num_programs(1) - 1)
    def _():
        h = jnp.maximum(acc_ref[...], 0.0)
        hid_f32_ref[...] = h
        hid_bf16_ref[...] = h.astype(jnp.bfloat16)


def _pass2_kernel(a_ref, hid_ref, bf3_ref, acc_ref):
    # acc += A[i, k] @ hid[k, :]; at the last K step: bf3 = acc.
    k = pl.program_id(1)

    @pl.when(k == 0)
    def _():
        acc_ref[...] = jnp.zeros_like(acc_ref)

    acc_ref[...] += jnp.dot(a_ref[...], hid_ref[...],
                            preferred_element_type=jnp.float32)

    @pl.when(k == pl.num_programs(1) - 1)
    def _():
        bf3_ref[...] = acc_ref[...]


# ------------------------------ Forward (jitted) -----------------------------
@functools.partial(jax.jit, static_argnames=("n", "bm", "bk", "vmem_limit"))
def _forward_impl(x, a_prep, w1, w3, *, n, bm, bk, vmem_limit):
    n_pad = a_prep.shape[0]
    hid = w1.shape[1]
    grid = (n_pad // bm, n_pad // bk)

    # Tiny-K matmul (K = num_features), badly shaped for the MXU: stays in XLA.
    xw1 = jnp.dot(x.astype(jnp.float32), w1.astype(jnp.float32),
                  precision=jax.lax.Precision.HIGHEST).astype(jnp.bfloat16)
    if n_pad != n:
        xw1 = jnp.pad(xw1, ((0, n_pad - n), (0, 0)))

    compiler_params = pltpu.CompilerParams(
        dimension_semantics=("parallel", "arbitrary"),
        vmem_limit_bytes=vmem_limit)

    a_spec = pl.BlockSpec((bm, bk), lambda i, k: (i, k))      # A stream (bf16)
    rhs_spec = pl.BlockSpec((bk, hid), lambda i, k: (k, 0))   # XW1 / hid (bf16)
    row_spec = pl.BlockSpec((bm, hid), lambda i, k: (i, 0))   # row-block outputs

    # ---- pass 1: hid = relu(A @ XW1)  (+ bf16 copy feeding pass 2) ----
    hid_f32, hid_bf16 = pl.pallas_call(
        _pass1_kernel,
        out_shape=(jax.ShapeDtypeStruct((n_pad, hid), jnp.float32),
                   jax.ShapeDtypeStruct((n_pad, hid), jnp.bfloat16)),
        grid_spec=pltpu.PrefetchScalarGridSpec(
            num_scalar_prefetch=0,
            grid=grid,
            in_specs=[a_spec, rhs_spec],
            out_specs=(row_spec, row_spec),
            scratch_shapes=[pltpu.VMEM((bm, hid), jnp.float32)]),
        compiler_params=compiler_params,
        cost_estimate=pl.CostEstimate(
            flops=2 * n_pad * n_pad * hid,
            transcendentals=0,
            bytes_accessed=(n_pad * n_pad * 2
                            + (n_pad // bm) * n_pad * hid * 2
                            + n_pad * hid * 6)),
    )(a_prep, xw1)

    # ---- pass 2: bf3 = A @ hid ----
    # TODO(synk): the dead `A @ drop_x @ W2` branch of the original forward is
    # overwritten before use in PyTorch; it is intentionally not computed.
    bf3 = pl.pallas_call(
        _pass2_kernel,
        out_shape=jax.ShapeDtypeStruct((n_pad, hid), jnp.float32),
        grid_spec=pltpu.PrefetchScalarGridSpec(
            num_scalar_prefetch=0,
            grid=grid,
            in_specs=[a_spec, rhs_spec],
            out_specs=row_spec,
            scratch_shapes=[pltpu.VMEM((bm, hid), jnp.float32)]),
        compiler_params=compiler_params,
        cost_estimate=pl.CostEstimate(
            flops=2 * n_pad * n_pad * hid,
            transcendentals=0,
            bytes_accessed=(n_pad * n_pad * 2
                            + (n_pad // bm) * n_pad * hid * 2
                            + n_pad * hid * 4)),
    )(a_prep, hid_bf16)

    if n_pad != n:
        hid_f32 = hid_f32[:n]
        bf3 = bf3[:n]

    # Small, badly-MXU-shaped tail (K = hid, C = num_classes) + log_softmax
    # stay in XLA, keeping all kernel outputs lane-dense.
    fin = jnp.dot(bf3, w3.astype(jnp.float32),
                  preferred_element_type=jnp.float32)
    out = jnp.asarray(jax.nn.log_softmax(fin, axis=1))
    return (hid_f32, bf3, fin), out


# ------------------------------ Module wrapper --------------------------------
class MatrixGCNLayer3:
    """JAX/Pallas analogue of the PyTorch MatrixGCN_layer3 (eval mode)."""

    def __init__(self, mat, w1, w2, w3, *, row_block=None, col_block=None):
        n = mat.shape[0]
        hid = w1.shape[1]
        budget, self._vmem_limit = _vmem_budget_and_limit()
        self._bm, self._bk, self._n_pad = _choose_tiling(
            n, hid, budget, row_block, col_block)
        self._n = n
        # Once-per-graph prep (like the PyTorch Parameter): cast the N^2
        # adjacency to bf16 and zero-pad it; per-forward calls never re-stream
        # it through an XLA cast/pad.
        a = mat.astype(jnp.bfloat16)
        if self._n_pad != n:
            pad = self._n_pad - n
            a = jnp.pad(a, ((0, pad), (0, pad)))
        self._a = a
        self._w1 = jnp.asarray(w1, jnp.float32)
        self._w3 = jnp.asarray(w3, jnp.float32)
        # TODO(synk): w2 (linear2) is dead in the original forward (its result
        # is overwritten by relu(x) before use), so it is stored but unused.
        self._w2 = jnp.asarray(w2, jnp.float32)

    def __call__(self, x):
        return _forward_impl(x, self._a, self._w1, self._w3,
                             n=self._n, bm=self._bm, bk=self._bk,
                             vmem_limit=self._vmem_limit)


# ---------------------------------------------------------------------------
# Host-side glue: deterministic parameter / adjacency construction.
# ---------------------------------------------------------------------------
def _xavier_uniform(key, shape):
    fan_in, fan_out = shape
    limit = (6.0 / (fan_in + fan_out)) ** 0.5
    return jax.random.uniform(key, shape, jnp.float32, -limit, limit)


def _build_normalized_adj(edge_index, num_nodes):
    """convert_edge2adj + I, then row-normalize (each row sums to 1)."""
    adj = jnp.zeros((num_nodes, num_nodes), jnp.float32)
    src, dst = edge_index
    adj = adj.at[src, dst].set(1.0)
    adj = adj.at[dst, src].set(1.0)            # undirected adjacency
    adj = adj + jnp.eye(num_nodes, dtype=jnp.float32)
    return adj / jnp.sum(adj, axis=1, keepdims=True)


if __name__ == "__main__":
    num_nodes, num_features, hid_dim, num_classes = 256, 16, 128, 4

    key = jax.random.PRNGKey(0)
    k_x, k_w1, k_w2, k_w3 = jax.random.split(key, 4)

    # Node features.
    x = jax.random.normal(k_x, (num_nodes, num_features), jnp.float32)

    # Deterministic graph: ring + (i, i+7) chords.
    src = jnp.arange(num_nodes, dtype=jnp.int32)
    edge_index = (jnp.concatenate([src, src]),
                  jnp.concatenate([(src + 1) % num_nodes, (src + 7) % num_nodes]))
    mat = _build_normalized_adj(edge_index, num_nodes)

    # Parameters (xavier_uniform_ shapes from __init__).
    w1 = _xavier_uniform(k_w1, (num_features, hid_dim))
    w2 = _xavier_uniform(k_w2, (hid_dim, hid_dim))   # dead in the forward pass
    w3 = _xavier_uniform(k_w3, (hid_dim, num_classes))

    # Plain f32 reference (the kernels feed the A matmuls in bf16 with f32
    # accumulation, hence the loose tolerance).
    h_ref = jnp.maximum(mat @ (x @ w1), 0.0)
    bf3_ref = mat @ h_ref
    fin_ref = bf3_ref @ w3
    out_ref = jax.nn.log_softmax(fin_ref, axis=1)
    tol = dict(atol=5e-2, rtol=5e-2)

    # Run 1: auto tiling (whole contraction resident, 2 row blocks).
    # Run 2: forced 128x128 blocks -> exercises the K-tiled accumulation path.
    for blocks in (dict(), dict(row_block=128, col_block=128)):
        model = MatrixGCNLayer3(mat, w1, w2, w3, **blocks)
        (hid_x, bf3, fin_x), out = model(x)
        jax.block_until_ready((hid_x, bf3, fin_x, out))

        assert hid_x.shape == (num_nodes, hid_dim)
        assert bf3.shape == (num_nodes, hid_dim)
        assert fin_x.shape == (num_nodes, num_classes)
        assert out.shape == (num_nodes, num_classes)
        assert jnp.allclose(hid_x, h_ref, **tol)
        assert jnp.allclose(bf3, bf3_ref, **tol)
        assert jnp.allclose(fin_x, fin_ref, **tol)
        assert jnp.allclose(out, out_ref, **tol)

    print("KERNEL_OK")
</pallas_src>

<mosaic_0001>
module attributes {stable_mosaic.version = 11 : i64} {
  func.func @_pass1_kernel(%arg0: i32, %arg1: i32, %arg2: memref<128x256xbf16, #tpu.memory_space<vmem>>, %arg3: memref<256x128xbf16, #tpu.memory_space<vmem>>, %arg4: memref<128x128xf32, #tpu.memory_space<vmem>>, %arg5: memref<128x128xbf16, #tpu.memory_space<vmem>>, %arg6: memref<128x128xf32, #tpu.memory_space<vmem>>) attributes {dimension_semantics = [#tpu.dimension_semantics<parallel>, #tpu.dimension_semantics<arbitrary>], iteration_bounds = array<i64: 2, 1>, scalar_prefetch = 0 : i64, scratch_operands = 1 : i64, tpu.core_type = #tpu.core_type<tc>, window_params = [{transform_indices = @transform_0, window_bounds = array<i64: 128, 256>}, {transform_indices = @transform_1, window_bounds = array<i64: 256, 128>}, {transform_indices = @transform_2, window_bounds = array<i64: 128, 128>}, {transform_indices = @transform_3, window_bounds = array<i64: 128, 128>}]} {
    %c0_i32 = arith.constant 0 : i32
    %0 = arith.cmpi eq, %arg1, %c0_i32 : i32
    %1 = arith.extui %0 : i1 to i32
    %c0_i32_0 = arith.constant 0 : i32
    %2 = arith.cmpi ne, %1, %c0_i32_0 : i32
    scf.if %2 {
      %cst_10 = arith.constant 0.000000e+00 : f32
      %12 = vector.broadcast %cst_10 : f32 to vector<128x128xf32>
      %c0_11 = arith.constant 0 : index
      %c0_12 = arith.constant 0 : index
      %13 = vector.load %arg6[%c0_11, %c0_12] : memref<128x128xf32, #tpu.memory_space<vmem>>, vector<128x128xf32>
      tpu.vector_store %arg6[%c0_11, %c0_12], %12 {strides = array<i32>} : memref<128x128xf32, #tpu.memory_space<vmem>>, vector<128x128xf32>,
    } else {
    }
    %c0 = arith.constant 0 : index
    %c0_1 = arith.constant 0 : index
    %3 = vector.load %arg6[%c0, %c0_1] : memref<128x128xf32, #tpu.memory_space<vmem>>, vector<128x128xf32>
    %c0_2 = arith.constant 0 : index
    %c0_3 = arith.constant 0 : index
    %4 = vector.load %arg2[%c0_2, %c0_3] : memref<128x256xbf16, #tpu.memory_space<vmem>>, vector<128x256xbf16>
    %c0_4 = arith.constant 0 : index
    %c0_5 = arith.constant 0 : index
    %5 = vector.load %arg3[%c0_4, %c0_5] : memref<256x128xbf16, #tpu.memory_space<vmem>>, vector<256x128xbf16>
    %cst = arith.constant dense<0.000000e+00> : vector<128x128xf32>
    %6 = tpu.matmul %4, %5, %cst {dimension_numbers = #tpu.dot_dimension_numbers<[1], [0], [0], [1], [0, 0, 1, 1], [], []>} : vector<128x256xbf16>, vector<256x128xbf16>, vector<128x128xf32> -> vector<128x128xf32>
    %7 = arith.addf %3, %6 : vector<128x128xf32>
    %c0_6 = arith.constant 0 : index
    %c0_7 = arith.constant 0 : index
    %8 = vector.load %arg6[%c0_6, %c0_7] : memref<128x128xf32, #tpu.memory_space<vmem>>, vector<128x128xf32>
    tpu.vector_store %arg6[%c0_6, %c0_7], %7 {strides = array<i32>} : memref<128x128xf32, #tpu.memory_space<vmem>>, vector<128x128xf32>,
    %c0_i32_8 = arith.constant 0 : i32
    %9 = arith.cmpi eq, %arg1, %c0_i32_8 : i32
    %10 = arith.extui %9 : i1 to i32
    %c0_i32_9 = arith.constant 0 : i32
    %11 = arith.cmpi ne, %10, %c0_i32_9 : i32
    scf.if %11 {
      %c0_10 = arith.constant 0 : index
      %c0_11 = arith.constant 0 : index
      %12 = vector.load %arg6[%c0_10, %c0_11] : memref<128x128xf32, #tpu.memory_space<vmem>>, vector<128x128xf32>
      %cst_12 = arith.constant 0.000000e+00 : f32
      %13 = vector.broadcast %cst_12 : f32 to vector<128x128xf32>
      %14 = arith.maximumf %12, %13 : vector<128x128xf32>
      %c0_13 = arith.constant 0 : index
      %c0_14 = arith.constant 0 : index
      %15 = vector.load %arg4[%c0_13, %c0_14] : memref<128x128xf32, #tpu.memory_space<vmem>>, vector<128x128xf32>
      tpu.vector_store %arg4[%c0_13, %c0_14], %14 {strides = array<i32>} : memref<128x128xf32, #tpu.memory_space<vmem>>, vector<128x128xf32>,
      %16 = arith.truncf %14 : vector<128x128xf32> to vector<128x128xbf16>
      %c0_15 = arith.constant 0 : index
      %c0_16 = arith.constant 0 : index
      %17 = vector.load %arg5[%c0_15, %c0_16] : memref<128x128xbf16, #tpu.memory_space<vmem>>, vector<128x128xbf16>
      tpu.vector_store %arg5[%c0_15, %c0_16], %16 {strides = array<i32>} : memref<128x128xbf16, #tpu.memory_space<vmem>>, vector<128x128xbf16>,
    } else {
    }
    return
  }
  func.func @transform_0(%arg0: i32, %arg1: i32) -> (i32, i32) {
    %c0_i32 = arith.constant 0 : i32
    return %arg0, %arg1 : i32, i32
  }
  func.func @transform_1(%arg0: i32, %arg1: i32) -> (i32, i32) {
    %c0_i32 = arith.constant 0 : i32
    %c0_i32_0 = arith.constant 0 : i32
    return %arg1, %c0_i32 : i32, i32
  }
  func.func @transform_2(%arg0: i32, %arg1: i32) -> (i32, i32) {
    %c0_i32 = arith.constant 0 : i32
    %c0_i32_0 = arith.constant 0 : i32
    return %arg0, %c0_i32 : i32, i32
  }
  func.func @transform_3(%arg0: i32, %arg1: i32) -> (i32, i32) {
    %c0_i32 = arith.constant 0 : i32
    %c0_i32_0 = arith.constant 0 : i32
    return %arg0, %c0_i32 : i32, i32
  }
}

module attributes {stable_mosaic.version = 11 : i64} {
  func.func @_pass2_kernel(%arg0: i32, %arg1: i32, %arg2: memref<128x256xbf16, #tpu.memory_space<vmem>>, %arg3: memref<256x128xbf16, #tpu.memory_space<vmem>>, %arg4: memref<128x128xf32, #tpu.memory_space<vmem>>, %arg5: memref<128x128xf32, #tpu.memory_space<vmem>>) attributes {dimension_semantics = [#tpu.dimension_semantics<parallel>, #tpu.dimension_semantics<arbitrary>], iteration_bounds = array<i64: 2, 1>, scalar_prefetch = 0 : i64, scratch_operands = 1 : i64, tpu.core_type = #tpu.core_type<tc>, window_params = [{transform_indices = @transform_0, window_bounds = array<i64: 128, 256>}, {transform_indices = @transform_1, window_bounds = array<i64: 256, 128>}, {transform_indices = @transform_2, window_bounds = array<i64: 128, 128>}]} {
    %c0_i32 = arith.constant 0 : i32
    %0 = arith.cmpi eq, %arg1, %c0_i32 : i32
    %1 = arith.extui %0 : i1 to i32
    %c0_i32_0 = arith.constant 0 : i32
    %2 = arith.cmpi ne, %1, %c0_i32_0 : i32
    scf.if %2 {
      %cst_10 = arith.constant 0.000000e+00 : f32
      %12 = vector.broadcast %cst_10 : f32 to vector<128x128xf32>
      %c0_11 = arith.constant 0 : index
      %c0_12 = arith.constant 0 : index
      %13 = vector.load %arg5[%c0_11, %c0_12] : memref<128x128xf32, #tpu.memory_space<vmem>>, vector<128x128xf32>
      tpu.vector_store %arg5[%c0_11, %c0_12], %12 {strides = array<i32>} : memref<128x128xf32, #tpu.memory_space<vmem>>, vector<128x128xf32>,
    } else {
    }
    %c0 = arith.constant 0 : index
    %c0_1 = arith.constant 0 : index
    %3 = vector.load %arg5[%c0, %c0_1] : memref<128x128xf32, #tpu.memory_space<vmem>>, vector<128x128xf32>
    %c0_2 = arith.constant 0 : index
    %c0_3 = arith.constant 0 : index
    %4 = vector.load %arg2[%c0_2, %c0_3] : memref<128x256xbf16, #tpu.memory_space<vmem>>, vector<128x256xbf16>
    %c0_4 = arith.constant 0 : index
    %c0_5 = arith.constant 0 : index
    %5 = vector.load %arg3[%c0_4, %c0_5] : memref<256x128xbf16, #tpu.memory_space<vmem>>, vector<256x128xbf16>
    %cst = arith.constant dense<0.000000e+00> : vector<128x128xf32>
    %6 = tpu.matmul %4, %5, %cst {dimension_numbers = #tpu.dot_dimension_numbers<[1], [0], [0], [1], [0, 0, 1, 1], [], []>} : vector<128x256xbf16>, vector<256x128xbf16>, vector<128x128xf32> -> vector<128x128xf32>
    %7 = arith.addf %3, %6 : vector<128x128xf32>
    %c0_6 = arith.constant 0 : index
    %c0_7 = arith.constant 0 : index
    %8 = vector.load %arg5[%c0_6, %c0_7] : memref<128x128xf32, #tpu.memory_space<vmem>>, vector<128x128xf32>
    tpu.vector_store %arg5[%c0_6, %c0_7], %7 {strides = array<i32>} : memref<128x128xf32, #tpu.memory_space<vmem>>, vector<128x128xf32>,
    %c0_i32_8 = arith.constant 0 : i32
    %9 = arith.cmpi eq, %arg1, %c0_i32_8 : i32
    %10 = arith.extui %9 : i1 to i32
    %c0_i32_9 = arith.constant 0 : i32
    %11 = arith.cmpi ne, %10, %c0_i32_9 : i32
    scf.if %11 {
      %c0_10 = arith.constant 0 : index
      %c0_11 = arith.constant 0 : index
      %12 = vector.load %arg5[%c0_10, %c0_11] : memref<128x128xf32, #tpu.memory_space<vmem>>, vector<128x128xf32>
      %c0_12 = arith.constant 0 : index
      %c0_13 = arith.constant 0 : index
      %13 = vector.load %arg4[%c0_12, %c0_13] : memref<128x128xf32, #tpu.memory_space<vmem>>, vector<128x128xf32>
      tpu.vector_store %arg4[%c0_12, %c0_13], %12 {strides = array<i32>} : memref<128x128xf32, #tpu.memory_space<vmem>>, vector<128x128xf32>,
    } else {
    }
    return
  }
  func.func @transform_0(%arg0: i32, %arg1: i32) -> (i32, i32) {
    %c0_i32 = arith.constant 0 : i32
    return %arg0, %arg1 : i32, i32
  }
  func.func @transform_1(%arg0: i32, %arg1: i32) -> (i32, i32) {
    %c0_i32 = arith.constant 0 : i32
    %c0_i32_0 = arith.constant 0 : i32
    return %arg1, %c0_i32 : i32, i32
  }
  func.func @transform_2(%arg0: i32, %arg1: i32) -> (i32, i32) {
    %c0_i32 = arith.constant 0 : i32
    %c0_i32_0 = arith.constant 0 : i32
    return %arg0, %c0_i32 : i32, i32
  }
}

</mosaic_0001>

<bundles_post_ra>
// kernel: _forward_impl.3
= control target key start
LH: loop header
LB: loop body
LE: loop exit
PB: predicated region body
PF: predicated region fallthrough
CT: control target
= control target key end

     0   :  { %s940_s9 = smov 0   ;;  %s942_s10 = smov 0   ;;  %s1064_s0 = inlined_call_operand.vmem [shape: bf16[256,256], index: 0, kind: input, shape index: {}]   ;;  %s1065_s1 = inlined_call_operand.vmem [shape: bf16[256,128], index: 1, kind: input, shape index: {}]   ;;  %s1066_s2 = inlined_call_operand.vmem [shape: f32[256,128], index: 2, kind: output, shape index: {}]  }
   0x1   :  { %s944_s11 = smov 0  }
   0x2 LB: > { %s24_s12 = sadd.s32 1, %s919_s10  ;;  %p716_p0 = scmp.ge.s32.totalorder %s923_s11, 1  ;;  %s923_s11 = sphi %s944_s11, %s12_s11   ;;  %s919_s10 = sphi %s942_s10, %s1068_s10   ;;  %s915_s9 = sphi %s940_s9, %s1067_s9  }
   0x3   : > { %p26_p1 = scmp.ge.s32.totalorder %s24_s12, 2  ;;  %p144_p2 = scmp.lt.s32.totalorder %s923_s11, 3 }
   0x5   : > { %s1070_s12 = smov (%p26_p1, %s24_s12), 0  ;;  %p145_p3 = pnand %p716_p0, %p144_p2 }
   0x6   : > { %s717_s15 = sshll.u32 (!%p145_p3), %s915_s9, 4 }
   0x7   : > { %148 = sbr.rel (%p145_p3) target bundleno = 271 (0x10f), region = 28  ;;  %p178_p4 = scmp.lt.s32.totalorder (!%p145_p3), %s717_s15, 31 }
   0xc   : > { %v861_v0 = vld [vmem:[%s1065_s1 + $0x78] sm:$0xff]   ;;  %v863_v2 = vld [vmem:[%s1065_s1 + $0x70] sm:$0xff]   ;;  %v865_v4 = vld [vmem:[%s1065_s1 + $0x68] sm:$0xff]   ;;  %s1072_s15 = smov (!%p178_p4, %s717_s15), 31 }
   0xd   : > { %v862_v1 = vld [vmem:[%s1065_s1 + $0x38] sm:$0xff]   ;;  %757 = vmatprep.subr.bf16.mxu0 %v861_v0  ;;  %821 = vmatprep.subr.bf16.mxu1 %v861_v0  ;;  %v864_v3 = vld [vmem:[%s1065_s1 + $0x30] sm:$0xff]   ;;  %v866_v5 = vld [vmem:[%s1065_s1 + $0x28] sm:$0xff]   ;;  %s756_s30 = sshll.u32 %s1072_s15, 3 }
   0xe   : > { %758 = vmatpush3.bf16.msra.mxu0 %v862_v1  ;;  %829 = vmatpush3.bf16.msra.mxu1 %v862_v1  ;;  %v867_v6 = vld [vmem:[%s1065_s1 + $0x60] sm:$0xff]   ;;  %v869_v8 = vld [vmem:[%s1065_s1 + $0x58] sm:$0xff]   ;;  %s993_s7 = scalar_lea.vmem %s1064_s0, %s756_s30  ;;  %v871_v10 = vld [vmem:[%s1065_s1 + $0x50] sm:$0xff]   ;;  %s1037_s28 = scalar_lea.vmem %s1066_s2, %s756_s30 }
   0xf   : > { %759 = vmatprep.subr.bf16.mxu0 %v863_v2  ;;  %822 = vmatprep.subr.bf16.mxu1 %v863_v2  ;;  %v868_v7 = vld [vmem:[%s1065_s1 + $0x20] sm:$0xff]   ;;  %v870_v9 = vld [vmem:[%s1065_s1 + $0x18] sm:$0xff]   ;;  %v872_v13 = vld [vmem:[%s1065_s1 + $0x10] sm:$0xff]  }
  0x10   : > { %v879_v11 = vld [vmem:[%s993_s7 + $0x4] ss:$8 sps:$4 sm:$0xff]   ;;  %v877_v18 = vld [vmem:[%s993_s7] ss:$8 sps:$4 sm:$0xff]   ;;  %v883_v20 = vld [vmem:[%s993_s7 + $0x14] ss:$8 sps:$4 sm:$0xff]  }
  0x11   : > { %v882_v12 = vld [vmem:[%s993_s7 + $0x44] ss:$8 sps:$4 sm:$0xff]   ;;  %493 = vmatprep.mubr.bf16.mxu0 %v879_v11  ;;  %v880_v19 = vld [vmem:[%s993_s7 + $0x40] ss:$8 sps:$4 sm:$0xff]   ;;  %v885_v21 = vld [vmem:[%s993_s7 + $0x54] ss:$8 sps:$4 sm:$0xff]  }
  0x12   : > { %760 = vmatpush3.bf16.msra.mxu0 %v864_v3  ;;  %830 = vmatpush3.bf16.msra.mxu1 %v864_v3  ;;  %v873_v14 = vld [vmem:[%s1065_s1 + $0x48] sm:$0xff]   ;;  %v875_v16 = vld [vmem:[%s1065_s1 + $0x40] sm:$0xff]   ;;  %v887_v22 = vld [vmem:[%s993_s7 + $0x10] ss:$8 sps:$4 sm:$0xff]  }
  0x13   : > { %761 = vmatprep.subr.bf16.mxu0 %v865_v4  ;;  %823 = vmatprep.subr.bf16.mxu1 %v865_v4  ;;  %v874_v15 = vld [vmem:[%s1065_s1 + $0x8] sm:$0xff]   ;;  %v876_v17 = vld [vmem:[%s1065_s1] sm:$0xff]   ;;  %v888_v23 = vld [vmem:[%s993_s7 + $0x50] ss:$8 sps:$4 sm:$0xff]  }
  0x14   : > { %525 = vmatprep.mubr.bf16.mxu1 %v882_v12  ;;  %v889_v24 = vld [vmem:[%s993_s7 + $0x24] ss:$8 sps:$4 sm:$0xff]   ;;  %v893_v26 = vld [vmem:[%s993_s7 + $0x20] ss:$8 sps:$4 sm:$0xff]   ;;  %v895_v28 = vld [vmem:[%s993_s7 + $0x34] ss:$8 sps:$4 sm:$0xff]  }
  0x15   : > { %v891_v25 = vld [vmem:[%s993_s7 + $0x64] ss:$8 sps:$4 sm:$0xff]   ;;  %v894_v27 = vld [vmem:[%s993_s7 + $0x60] ss:$8 sps:$4 sm:$0xff]   ;;  %v897_v29 = vld [vmem:[%s993_s7 + $0x74] ss:$8 sps:$4 sm:$0xff]  }
  0x16   : > { %762 = vmatpush3.bf16.msra.mxu0 %v866_v5  ;;  %831 = vmatpush3.bf16.msra.mxu1 %v866_v5  ;;  %v899_v30 = vld [vmem:[%s993_s7 + $0x30] ss:$8 sps:$4 sm:$0xff]  }
  0x17   : > { %763 = vmatprep.subr.bf16.mxu0 %v867_v6  ;;  %824 = vmatprep.subr.bf16.mxu1 %v867_v6  ;;  %v900_v31 = vld [vmem:[%s993_s7 + $0x70] ss:$8 sps:$4 sm:$0xff]  }
  0x1a   : > { %764 = vmatpush3.bf16.msra.mxu0 %v868_v7  ;;  %832 = vmatpush3.bf16.msra.mxu1 %v868_v7 }
  0x1b   : > { %765 = vmatprep.subr.bf16.mxu0 %v869_v8  ;;  %825 = vmatprep.subr.bf16.mxu1 %v869_v8 }
  0x1e   : > { %766 = vmatpush3.bf16.msra.mxu0 %v870_v9  ;;  %833 = vmatpush3.bf16.msra.mxu1 %v870_v9 }
  0x1f   : > { %767 = vmatprep.subr.bf16.mxu0 %v871_v10  ;;  %826 = vmatprep.subr.bf16.mxu1 %v871_v10 }
  0x22   : > { %768 = vmatpush3.bf16.msra.mxu0 %v872_v13  ;;  %834 = vmatpush3.bf16.msra.mxu1 %v872_v13 }
  0x23   : > { %769 = vmatprep.subr.bf16.mxu0 %v873_v14  ;;  %827 = vmatprep.subr.bf16.mxu1 %v873_v14 }
  0x26   : > { %770 = vmatpush3.bf16.msra.mxu0 %v874_v15  ;;  %835 = vmatpush3.bf16.msra.mxu1 %v874_v15 }
  0x27   : > { %771 = vmatprep.subr.bf16.mxu0 %v875_v16  ;;  %828 = vmatprep.subr.bf16.mxu1 %v875_v16 }
  0x2a   : > { %772 = vmatpush3.bf16.msra.mxu0 %v876_v17  ;;  %836 = vmatpush3.bf16.msra.mxu1 %v876_v17 }
  0x2d   : > { %494 = vmatmul.mubr.bf16.vlgmr.msra.gmra.mxu0 %v877_v18  ;;  %526 = vmatmul.mubr.bf16.vlgmr.msra.gmra.mxu1 %v880_v19 }
  0x2e   : > { %501 = vmatprep.mubr.bf16.mxu0 %v883_v20  ;;  %533 = vmatprep.mubr.bf16.mxu1 %v885_v21 }
  0x35   : > { %502 = vmatmul.mubr.bf16.gmra.mxu0 %v887_v22  ;;  %534 = vmatmul.mubr.bf16.gmra.mxu1 %v888_v23 }
  0x36   : > { %509 = vmatprep.mubr.bf16.mxu0 %v889_v24  ;;  %541 = vmatprep.mubr.bf16.mxu1 %v891_v25 }
  0x3d   : > { %510 = vmatmul.mubr.bf16.gmra.mxu0 %v893_v26  ;;  %542 = vmatmul.mubr.bf16.gmra.mxu1 %v894_v27 }
  0x3e   : > { %517 = vmatprep.mubr.bf16.mxu0 %v895_v28  ;;  %549 = vmatprep.mubr.bf16.mxu1 %v897_v29 }
  0x45   : > { %518 = vmatmul.mubr.bf16.gmra.mxu0 %v899_v30  ;;  %550 = vmatmul.mubr.bf16.gmra.mxu1 %v900_v31 }
  0xed   : > { %v773_v32 = vpop.f32.mrf.mxu0  ;;  %v797_v33 = vpop.f32.mrf.mxu1 }
  0xef   : > { %v774_v34 = vpop.f32.mrf.mxu0  ;;  %v798_v35 = vpop.f32.mrf.mxu1 }
  0xf0   : > { %v775_v36 = vadd.f32 %v774_v34, %v773_v32  ;;  %v799_v37 = vadd.f32 %v798_v35, %v797_v33 }
  0xf1   : > { %v776_v38 = vpop.f32.mrf.mxu0  ;;  %v800_v39 = vpop.f32.mrf.mxu1 }
  0xf2   : > { %609 = vst [vmem:[%s1037_s28] sm:$0xff] %v775_v36  ;;  %617 = vst [vmem:[%s1037_s28 + $0x40] sm:$0xff] %v799_v37 }
  0xf3   : > { %v777_v40 = vpop.f32.mrf.mxu0  ;;  %v801_v41 = vpop.f32.mrf.mxu1 }
  0xf4   : > { %v778_v42 = vadd.f32 %v777_v40, %v776_v38  ;;  %v802_v43 = vadd.f32 %v801_v41, %v800_v39 }
  0xf5   : > { %v779_v44 = vpop.f32.mrf.mxu0  ;;  %v803_v45 = vpop.f32.mrf.mxu1 }
  0xf6   : > { %610 = vst [vmem:[%s1037_s28 + $0x8] sm:$0xff] %v778_v42  ;;  %618 = vst [vmem:[%s1037_s28 + $0x48] sm:$0xff] %v802_v43 }
  0xf7   : > { %v780_v46 = vpop.f32.mrf.mxu0  ;;  %v804_v47 = vpop.f32.mrf.mxu1 }
  0xf8   : > { %v781_v48 = vadd.f32 %v780_v46, %v779_v44  ;;  %v805_v49 = vadd.f32 %v804_v47, %v803_v45 }
  0xf9   : > { %v782_v50 = vpop.f32.mrf.mxu0  ;;  %v806_v51 = vpop.f32.mrf.mxu1 }
  0xfa   : > { %611 = vst [vmem:[%s1037_s28 + $0x10] sm:$0xff] %v781_v48  ;;  %619 = vst [vmem:[%s1037_s28 + $0x50] sm:$0xff] %v805_v49 }
  0xfb   : > { %v783_v52 = vpop.f32.mrf.mxu0  ;;  %v807_v53 = vpop.f32.mrf.mxu1 }
  0xfc   : > { %v784_v54 = vadd.f32 %v783_v52, %v782_v50  ;;  %v808_v55 = vadd.f32 %v807_v53, %v806_v51 }
  0xfd   : > { %v785_v56 = vpop.f32.mrf.mxu0  ;;  %v809_v57 = vpop.f32.mrf.mxu1 }
  0xfe   : > { %612 = vst [vmem:[%s1037_s28 + $0x18] sm:$0xff] %v784_v54  ;;  %620 = vst [vmem:[%s1037_s28 + $0x58] sm:$0xff] %v808_v55 }
  0xff   : > { %v786_v58 = vpop.f32.mrf.mxu0  ;;  %v810_v59 = vpop.f32.mrf.mxu1 }
 0x100   : > { %v787_v60 = vadd.f32 %v786_v58, %v785_v56  ;;  %v811_v61 = vadd.f32 %v810_v59, %v809_v57 }
 0x101   : > { %v788_v62 = vpop.f32.mrf.mxu0  ;;  %v812_v63 = vpop.f32.mrf.mxu1 }
 0x102   : > { %613 = vst [vmem:[%s1037_s28 + $0x20] sm:$0xff] %v787_v60  ;;  %621 = vst [vmem:[%s1037_s28 + $0x60] sm:$0xff] %v811_v61 }
 0x103   : > { %v789_v0 = vpop.f32.mrf.mxu0  ;;  %v813_v1 = vpop.f32.mrf.mxu1 }
 0x104   : > { %v790_v2 = vadd.f32 %v789_v0, %v788_v62  ;;  %v814_v3 = vadd.f32 %v813_v1, %v812_v63 }
 0x105   : > { %v791_v4 = vpop.f32.mrf.mxu0  ;;  %v815_v5 = vpop.f32.mrf.mxu1 }
 0x106   : > { %614 = vst [vmem:[%s1037_s28 + $0x28] sm:$0xff] %v790_v2  ;;  %622 = vst [vmem:[%s1037_s28 + $0x68] sm:$0xff] %v814_v3 }
 0x107   : > { %v792_v6 = vpop.f32.mrf.mxu0  ;;  %v816_v7 = vpop.f32.mrf.mxu1 }
 0x108   : > { %v793_v8 = vadd.f32 %v792_v6, %v791_v4  ;;  %v817_v9 = vadd.f32 %v816_v7, %v815_v5 }
 0x109   : > { %v794_v10 = vpop.f32.mrf.mxu0  ;;  %v818_v11 = vpop.f32.mrf.mxu1 }
 0x10a   : > { %615 = vst [vmem:[%s1037_s28 + $0x30] sm:$0xff] %v793_v8  ;;  %623 = vst [vmem:[%s1037_s28 + $0x70] sm:$0xff] %v817_v9 }
 0x10b   : > { %v795_v12 = vpop.f32.mrf.mxu0  ;;  %v819_v13 = vpop.f32.mrf.mxu1 }
 0x10c   : > { %v796_v14 = vadd.f32 %v795_v12, %v794_v10  ;;  %v820_v15 = vadd.f32 %v819_v13, %v818_v11 }
 0x10e   : > { %616 = vst [vmem:[%s1037_s28 + $0x38] sm:$0xff] %v796_v14  ;;  %624 = vst [vmem:[%s1037_s28 + $0x78] sm:$0xff] %v820_v15 }
 0x10f PF: > { %s12_s11 = sadd.s32 1, %s923_s11   ;;  %s1067_s9 = smov %s919_s10 }
 0x110   : > { %p9_p5 = scmp.ge.s32.totalorder %s12_s11, 4   ;;  %s1068_s10 = smov %s1070_s12 }
 0x112   :  { %11 = sbr.rel (!%p9_p5) target bundleno = 2 (0x2), region = 69 }

// kernel: _forward_impl.2
= control target key start
LH: loop header
LB: loop body
LE: loop exit
PB: predicated region body
PF: predicated region fallthrough
CT: control target
= control target key end

     0   :  { %9 = vsyncpa [#allocation4], 0  ;;  %s1617_s0 = inlined_call_operand.hbm [shape: bf16[256,256], index: 0, kind: input, shape index: {}]   ;;  %s1618_s1 = inlined_call_operand.vmem [shape: bf16[256,128], index: 1, kind: input, shape index: {}]   ;;  %s1619_s2 = inlined_call_operand.hbm [shape: f32[256,128], index: 2, kind: output, shape index: {0}]   ;;  %s1620_s3 = inlined_call_operand.vmem [shape: bf16[256,128], index: 3, kind: output, shape index: {1}]  }
   0x1   :  { %11 = vsyncpa [#allocation4 + $0x1], 0 }
   0x2   :  { %12 = vsyncpa [#allocation5], 0 }
   0x3   :  { %14 = vsyncpa [#allocation5 + $0x1], 0  ;;  %s1368_s12 = smov 0   ;;  %s1370_s13 = smov 0  }
   0x4   :  { %s1372_s14 = smov 0   ;;  %s1374_s15 = smov 0  }
   0x5   :  { %s1376_s16 = smov 0   ;;  %s1378_s17 = smov 0  }
   0x6 LB: > { %s913_s18 = sadd.s32 4294967295, %s1340_s17   ;;  %s914_s19 = sadd.s32 4294967294, %s1340_s17   ;;  %s1340_s17 = sphi %s1378_s17, %s20_s17   ;;  %s1336_s16 = sphi %s1376_s16, %s1631_s16   ;;  %s1332_s15 = sphi %s1374_s15, %s1630_s15   ;;  %s1328_s14 = sphi %s1372_s14, %s1629_s14   ;;  %s1324_s13 = sphi %s1370_s13, %s1628_s13   ;;  %s1320_s12 = sphi %s1368_s12, %s1627_s12  }
   0x7   : > { %s32_s20 = sadd.s32 1, %s1336_s16  ;;  %s41_s21 = sadd.s32 1, %s1328_s14 }
   0x8   : > { %p34_p0 = scmp.ge.s32.totalorder %s32_s20, 2  ;;  %p48_p1 = scmp.ne.s32.totalorder %s1328_s14, %s1324_s13 }
   0x9   : > { %p49_p2 = scmp.eq.s32.totalorder %s1340_s17, 0  ;;  %p54_p3 = scmp.ne.s32.totalorder %s1324_s13, %s1320_s12 }
   0xa   : > { %s1633_s20 = smov (%p34_p0, %s32_s20), 0  ;;  %p55_p5 = scmp.eq.s32.totalorder %s913_s18, 0 }
   0xb   : > { %p1409_p4 = por %p49_p2, %p48_p1  ;;  %s36_s23 = ssub.s32 %s1336_s16, %s1633_s20 }
   0xc   : > { %p104_p6 = scmp.eq.s32.totalorder %s913_s18, 1  ;;  %p39_p7 = scmp.eq.s32.totalorder %s36_s23, 0 }
   0xd   : > { %p1415_p8 = por %p55_p5, %p54_p3  ;;  %p110_p10 = scmp.eq.s32.totalorder %s914_s19, 1 }
   0xe   : > { %p1419_p9 = por %p104_p6, %p48_p1  ;;  %p1138_p13 = scmp.lt.s32.totalorder %s1340_s17, 2 }
   0xf   : > { %s1424_s26 = scalar_select %p39_p7, %s1328_s14, %s41_s21  }
  0x10   : > { %p1426_p11 = por %p110_p10, %p54_p3  ;;  %s165_s28 = sand.u32 1, %s1328_s14  }
  0x11   : > { %s918_s29 = sshll.u32 %s165_s28, 7  ;;  %s981_s30 = sshll.u32 %s1336_s16, 11 }
  0x12   : > { %s178_s6 = scalar_lea.hbm %s1617_s0, %s981_s30  ;;  %s169_s7 = scalar_lea.vmem [#allocation3], %s918_s29 }
  0x13   : > { %s179_s8 = sshll.u32 %s169_s7, 4  ;;  %p1439_p0 = pnand %p1138_p13, %p1409_p4  ;;  %s180_s8 = int_to_ptr.vmem [resolvable:$true] %s179_s8 }
  0x14   : > { %p922_p1 = scmp.ge.s32.totalorder %s1340_s17, 1  ;;  %s166_s10 = scalar_lea.sflag [#allocation4], %s165_s28 }
  0x15   : > { %p1234_p2 = pneg %p1439_p0  ;;  %s1245_s11 = scalar_lea.vmem %s180_s8, 2048 }
  0x16   : > { %p1246_p3 = scmp.ne.s32.totalorder %s180_s8, %s1245_s11  ;;  %s1342_s18 = smov [#allocation3]  }
  0x17   : > { %s1250_s19 = sshll.u32 %s1342_s18, 4  ;;  %s1251_s19 = int_to_ptr.vmem [resolvable:$false] %s1250_s19 }
  0x18   : > { %p1248_p5 = pnand %p1246_p3, %p1234_p2  ;;  %s1252_s21 = scalar_lea.vmem %s1251_s19, 4096 }
  0x19   : > { %p1253_p7 = scmp.lt.s32.totalorder %s180_s8, %s1251_s19  ;;  %p1254_p10 = scmp.lt.s32.totalorder %s1252_s21, %s1245_s11 }
  0x1a   : > { %p1249_p6 = pneg %p1248_p5 }
  0x1b   : > { %p1255_p12 = por %p1254_p10, %p1253_p7 }
  0x1d   : > { %p1256_p4 = pnand %p1255_p12, %p1249_p6 }
  0x1f   : > { %1259 = shalt.err (!%p1256_p4)
}
  0x20   : > { %s1343_s22 = smov 128   ;;  %s1344_s23 = smov 8  }
  0x21   : > { %1133 = dma.hbm_to_vmem [thread:$0]  (!%p1439_p0), %s178_s6, 2048, %s180_s8, %s166_s10, %s1343_s22, %s1343_s22, %s1344_s23  }
  0x22   : > { %p187_p13 = scmp.lt.s32.totalorder %s1340_s17, 3 }
  0x24   : > { %p188_p2 = pnand %p922_p1, %p187_p13 }
  0x25   : > { %s1452_s28 = sand.u32 (!%p188_p2), 1, %s1324_s13  }
  0x26   : > { %191 = sbr.rel (%p188_p2) target bundleno = 318 (0x13e), region = 28  ;;  %s923_s29 = sshll.u32 (!%p188_p2), %s1452_s28, 7 }
  0x27   : > { %s194_s30 = scalar_lea.sflag (!%p188_p2), [#allocation4], %s1452_s28  ;;  %s1458_s4 = scalar_lea.vmem (!%p188_p2), [#allocation3], %s923_s29 }
  0x2b   : > { %1311 = dma.done.wait (%p1415_p8), %s194_s30, 2048  }
  0x2c   : > { %1313 = vsyncadd (%p1415_p8), %s194_s30, 4294965248  ;;  %v1192_v0 = vld [vmem:[%s1618_s1 + $0x78] sm:$0xff]   ;;  %v1194_v2 = vld [vmem:[%s1618_s1 + $0x70] sm:$0xff]   ;;  %s925_s9 = sshll.u32 %s1332_s15, 4  ;;  %s1345_s5 = smov [#allocation6]  }
  0x2d   : > { %v1193_v1 = vld [vmem:[%s1618_s1 + $0x38] sm:$0xff]   ;;  %1046 = vmatprep.subr.bf16.mxu0 %v1192_v0  ;;  %1110 = vmatprep.subr.bf16.mxu1 %v1192_v0  ;;  %v1195_v3 = vld [vmem:[%s1618_s1 + $0x30] sm:$0xff]   ;;  %v1196_v4 = vld [vmem:[%s1618_s1 + $0x68] sm:$0xff]   ;;  %p240_p8 = scmp.lt.s32.totalorder %s925_s9, 31  ;;  %s1264_s6 = sshll.u32 %s1345_s5, 4  ;;  %s1265_s6 = int_to_ptr.vmem [resolvable:$false] %s1264_s6 }
  0x2e   : > { %1047 = vmatpush3.bf16.msra.mxu0 %v1193_v1  ;;  %1118 = vmatpush3.bf16.msra.mxu1 %v1193_v1  ;;  %v1197_v5 = vld [vmem:[%s1618_s1 + $0x28] sm:$0xff]   ;;  %v1198_v6 = vld [vmem:[%s1618_s1 + $0x60] sm:$0xff]   ;;  %v1200_v8 = vld [vmem:[%s1618_s1 + $0x58] sm:$0xff]   ;;  %s1266_s7 = scalar_lea.vmem %s1265_s6, 4096 }
  0x2f   : > { %1048 = vmatprep.subr.bf16.mxu0 %v1194_v2  ;;  %1111 = vmatprep.subr.bf16.mxu1 %v1194_v2  ;;  %v1199_v7 = vld [vmem:[%s1618_s1 + $0x20] sm:$0xff]   ;;  %v1201_v9 = vld [vmem:[%s1618_s1 + $0x18] sm:$0xff]   ;;  %v1202_v10 = vld [vmem:[%s1618_s1 + $0x50] sm:$0xff]   ;;  %s1635_s9 = smov (!%p240_p8, %s925_s9), 31 }
  0x30   : > { %v1210_v11 = vld [vmem:[%s1458_s4 + $0x4] ss:$8 sps:$4 sm:$0xff]   ;;  %v1203_v13 = vld [vmem:[%s1618_s1 + $0x10] sm:$0xff]   ;;  %v1208_v18 = vld [vmem:[%s1458_s4] ss:$8 sps:$4 sm:$0xff]   ;;  %s926_s10 = sshll.u32 %s1635_s9, 2 }
  0x31   : > { %v1213_v12 = vld [vmem:[%s1458_s4 + $0x44] ss:$8 sps:$4 sm:$0xff]   ;;  %538 = vmatprep.mubr.bf16.mxu0 %v1210_v11  ;;  %v1211_v19 = vld [vmem:[%s1458_s4 + $0x40] ss:$8 sps:$4 sm:$0xff]   ;;  %v1214_v20 = vld [vmem:[%s1458_s4 + $0x14] ss:$8 sps:$4 sm:$0xff]   ;;  %s1538_s24 = scalar_lea.vmem %s1620_s3, %s926_s10 }
  0x32   : > { %1049 = vmatpush3.bf16.msra.mxu0 %v1195_v3  ;;  %1119 = vmatpush3.bf16.msra.mxu1 %v1195_v3  ;;  %v1204_v14 = vld [vmem:[%s1618_s1 + $0x48] sm:$0xff]   ;;  %v1206_v16 = vld [vmem:[%s1618_s1 + $0x40] sm:$0xff]   ;;  %v1216_v21 = vld [vmem:[%s1458_s4 + $0x54] ss:$8 sps:$4 sm:$0xff]  }
  0x33   : > { %1050 = vmatprep.subr.bf16.mxu0 %v1196_v4  ;;  %1112 = vmatprep.subr.bf16.mxu1 %v1196_v4  ;;  %v1205_v15 = vld [vmem:[%s1618_s1 + $0x8] sm:$0xff]   ;;  %v1207_v17 = vld [vmem:[%s1618_s1] sm:$0xff]   ;;  %v1218_v22 = vld [vmem:[%s1458_s4 + $0x10] ss:$8 sps:$4 sm:$0xff]  }
  0x34   : > { %570 = vmatprep.mubr.bf16.mxu1 %v1213_v12  ;;  %v1219_v23 = vld [vmem:[%s1458_s4 + $0x50] ss:$8 sps:$4 sm:$0xff]   ;;  %v1220_v24 = vld [vmem:[%s1458_s4 + $0x24] ss:$8 sps:$4 sm:$0xff]   ;;  %v1224_v26 = vld [vmem:[%s1458_s4 + $0x20] ss:$8 sps:$4 sm:$0xff]  }
  0x35   : > { %v1222_v25 = vld [vmem:[%s1458_s4 + $0x64] ss:$8 sps:$4 sm:$0xff]   ;;  %v1225_v27 = vld [vmem:[%s1458_s4 + $0x60] ss:$8 sps:$4 sm:$0xff]   ;;  %v1226_v28 = vld [vmem:[%s1458_s4 + $0x34] ss:$8 sps:$4 sm:$0xff]  }
  0x36   : > { %1051 = vmatpush3.bf16.msra.mxu0 %v1197_v5  ;;  %1120 = vmatpush3.bf16.msra.mxu1 %v1197_v5  ;;  %v1228_v29 = vld [vmem:[%s1458_s4 + $0x74] ss:$8 sps:$4 sm:$0xff]   ;;  %v1230_v30 = vld [vmem:[%s1458_s4 + $0x30] ss:$8 sps:$4 sm:$0xff]  }
  0x37   : > { %1052 = vmatprep.subr.bf16.mxu0 %v1198_v6  ;;  %1113 = vmatprep.subr.bf16.mxu1 %v1198_v6  ;;  %v1231_v31 = vld [vmem:[%s1458_s4 + $0x70] ss:$8 sps:$4 sm:$0xff]   ;;  %s1531_s4 = scalar_lea.vmem [#allocation6], %s923_s29  ;;  %s998_s29 = sshll.u32 %s1332_s15, 11 }
  0x38   : > { %s785_s19 = sshll.u32 %s1531_s4, 4  ;;  %s1563_s23 = scalar_lea.hbm %s1619_s2, %s998_s29  ;;  %s1565_s19 = int_to_ptr.vmem [resolvable:$true] %s785_s19 }
  0x39   : > { %s767_s15 = scalar_lea.sflag [#allocation5], %s1452_s28  ;;  %s1260_s30 = scalar_lea.vmem %s1565_s19, 2048 }
  0x3a   : > { %1053 = vmatpush3.bf16.msra.mxu0 %v1199_v7  ;;  %1121 = vmatpush3.bf16.msra.mxu1 %v1199_v7  ;;  %p1261_p12 = scmp.ne.s32.totalorder %s1565_s19, %s1260_s30  ;;  %p1267_p3 = scmp.lt.s32.totalorder %s1565_s19, %s1265_s6 }
  0x3b   : > { %1054 = vmatprep.subr.bf16.mxu0 %v1200_v8  ;;  %1114 = vmatprep.subr.bf16.mxu1 %v1200_v8  ;;  %p1268_p5 = scmp.lt.s32.totalorder %s1266_s7, %s1260_s30 }
  0x3c   : > { %p1262_p0 = pnand %p1261_p12, %p1419_p9 }
  0x3d   : > { %p1269_p6 = por %p1268_p5, %p1267_p3 }
  0x3e   : > { %1055 = vmatpush3.bf16.msra.mxu0 %v1201_v9  ;;  %1122 = vmatpush3.bf16.msra.mxu1 %v1201_v9  ;;  %p1263_p1 = pneg %p1262_p0 }
  0x3f   : > { %1056 = vmatprep.subr.bf16.mxu0 %v1202_v10  ;;  %1115 = vmatprep.subr.bf16.mxu1 %v1202_v10 }
  0x40   : > { %p1270_p7 = pnand %p1269_p6, %p1263_p1 }
  0x42   : > { %1057 = vmatpush3.bf16.msra.mxu0 %v1203_v13  ;;  %1123 = vmatpush3.bf16.msra.mxu1 %v1203_v13 }
  0x43   : > { %1058 = vmatprep.subr.bf16.mxu0 %v1204_v14  ;;  %1116 = vmatprep.subr.bf16.mxu1 %v1204_v14 }
  0x46   : > { %1059 = vmatpush3.bf16.msra.mxu0 %v1205_v15  ;;  %1124 = vmatpush3.bf16.msra.mxu1 %v1205_v15 }
  0x47   : > { %1060 = vmatprep.subr.bf16.mxu0 %v1206_v16  ;;  %1117 = vmatprep.subr.bf16.mxu1 %v1206_v16 }
  0x4a   : > { %1061 = vmatpush3.bf16.msra.mxu0 %v1207_v17  ;;  %1125 = vmatpush3.bf16.msra.mxu1 %v1207_v17 }
  0x4d   : > { %539 = vmatmul.mubr.bf16.vlgmr.msra.gmra.mxu0 %v1208_v18  ;;  %571 = vmatmul.mubr.bf16.vlgmr.msra.gmra.mxu1 %v1211_v19 }
  0x4e   : > { %546 = vmatprep.mubr.bf16.mxu0 %v1214_v20  ;;  %578 = vmatprep.mubr.bf16.mxu1 %v1216_v21 }
  0x55   : > { %547 = vmatmul.mubr.bf16.gmra.mxu0 %v1218_v22  ;;  %579 = vmatmul.mubr.bf16.gmra.mxu1 %v1219_v23 }
  0x56   : > { %554 = vmatprep.mubr.bf16.mxu0 %v1220_v24  ;;  %586 = vmatprep.mubr.bf16.mxu1 %v1222_v25 }
  0x5d   : > { %555 = vmatmul.mubr.bf16.gmra.mxu0 %v1224_v26  ;;  %587 = vmatmul.mubr.bf16.gmra.mxu1 %v1225_v27 }
  0x5e   : > { %562 = vmatprep.mubr.bf16.mxu0 %v1226_v28  ;;  %594 = vmatprep.mubr.bf16.mxu1 %v1228_v29 }
  0x65   : > { %563 = vmatmul.mubr.bf16.gmra.mxu0 %v1230_v30  ;;  %595 = vmatmul.mubr.bf16.gmra.mxu1 %v1231_v31 }
 0x10d   : > { %v1062_v32 = vpop.f32.mrf.mxu0  ;;  %v1086_v33 = vpop.f32.mrf.mxu1 }
 0x10f   : > { %v1063_v34 = vpop.f32.mrf.mxu0  ;;  %v1087_v35 = vpop.f32.mrf.mxu1 }
 0x110   : > { %v1064_v36 = vadd.f32 %v1063_v34, %v1062_v32  ;;  %v1088_v37 = vadd.f32 %v1087_v35, %v1086_v33 }
 0x111   : > { %v1065_v38 = vpop.f32.mrf.mxu0  ;;  %v1089_v39 = vpop.f32.mrf.mxu1 }
 0x112   : > { %v654_v40 = vmax.f32 %v1064_v36, 0.0  ;;  %v662_v41 = vmax.f32 %v1088_v37, 0.0 }
 0x113   : > { %v1066_v42 = vpop.f32.mrf.mxu0  ;;  %v1090_v43 = vpop.f32.mrf.mxu1 }
 0x114   : > { %670 = vst [vmem:[%s1531_s4] sm:$0xff] %v654_v40  ;;  %678 = vst [vmem:[%s1531_s4 + $0x40] sm:$0xff] %v662_v41  ;;  %v1067_v44 = vadd.f32 %v1066_v42, %v1065_v38  ;;  %v1091_v45 = vadd.f32 %v1090_v43, %v1089_v39 }
 0x115   : > { %v1068_v46 = vpop.f32.mrf.mxu0  ;;  %v1092_v47 = vpop.f32.mrf.mxu1 }
 0x116   : > { %v655_v48 = vmax.f32 %v1067_v44, 0.0  ;;  %v663_v49 = vmax.f32 %v1091_v45, 0.0 }
 0x117   : > { %v1069_v50 = vpop.f32.mrf.mxu0  ;;  %v1093_v51 = vpop.f32.mrf.mxu1 }
 0x118   : > { %671 = vst [vmem:[%s1531_s4 + $0x8] sm:$0xff] %v655_v48  ;;  %v1002_v52 = vpack.c.bf16 %v655_v48, %v654_v40  ;;  %679 = vst [vmem:[%s1531_s4 + $0x48] sm:$0xff] %v663_v49  ;;  %v1022_v53 = vpack.c.bf16 %v663_v49, %v662_v41  ;;  %v1070_v54 = vadd.f32 %v1069_v50, %v1068_v46 }
 0x119   : > { %v1094_v55 = vadd.f32 %v1093_v51, %v1092_v47  ;;  %v1071_v56 = vpop.f32.mrf.mxu0  ;;  %v1095_v57 = vpop.f32.mrf.mxu1 }
 0x11a   : > { %1003 = vst [vmem:[%s1538_s24] sm:$0xff] %v1002_v52   ;;  %1042 = vst [vmem:[%s1538_s24 + $0x20] sm:$0xff] %v1022_v53   ;;  %v656_v58 = vmax.f32 %v1070_v54, 0.0 }
 0x11b   : > { %v664_v59 = vmax.f32 %v1094_v55, 0.0  ;;  %v1072_v60 = vpop.f32.mrf.mxu0  ;;  %v1096_v61 = vpop.f32.mrf.mxu1 }
 0x11c   : > { %672 = vst [vmem:[%s1531_s4 + $0x10] sm:$0xff] %v656_v58  ;;  %v1073_v62 = vadd.f32 %v1072_v60, %v1071_v56  ;;  %v1097_v63 = vadd.f32 %v1096_v61, %v1095_v57 }
 0x11d   : > { %680 = vst [vmem:[%s1531_s4 + $0x50] sm:$0xff] %v664_v59  ;;  %v1074_v0 = vpop.f32.mrf.mxu0  ;;  %v1098_v1 = vpop.f32.mrf.mxu1 }
 0x11e   : > { %v657_v2 = vmax.f32 %v1073_v62, 0.0  ;;  %v665_v3 = vmax.f32 %v1097_v63, 0.0 }
 0x11f   : > { %v1075_v4 = vpop.f32.mrf.mxu0  ;;  %v1099_v5 = vpop.f32.mrf.mxu1 }
 0x120   : > { %673 = vst [vmem:[%s1531_s4 + $0x18] sm:$0xff] %v657_v2  ;;  %v1007_v6 = vpack.c.bf16 %v657_v2, %v656_v58  ;;  %681 = vst [vmem:[%s1531_s4 + $0x58] sm:$0xff] %v665_v3  ;;  %v1027_v7 = vpack.c.bf16 %v665_v3, %v664_v59  ;;  %v1076_v8 = vadd.f32 %v1075_v4, %v1074_v0 }
 0x121   : > { %v1100_v9 = vadd.f32 %v1099_v5, %v1098_v1  ;;  %v1077_v10 = vpop.f32.mrf.mxu0  ;;  %v1101_v11 = vpop.f32.mrf.mxu1 }
 0x122   : > { %1039 = vst [vmem:[%s1538_s24 + $0x8] sm:$0xff] %v1007_v6   ;;  %1043 = vst [vmem:[%s1538_s24 + $0x28] sm:$0xff] %v1027_v7   ;;  %v658_v12 = vmax.f32 %v1076_v8, 0.0 }
 0x123   : > { %v666_v13 = vmax.f32 %v1100_v9, 0.0  ;;  %v1078_v14 = vpop.f32.mrf.mxu0  ;;  %v1102_v15 = vpop.f32.mrf.mxu1 }
 0x124   : > { %674 = vst [vmem:[%s1531_s4 + $0x20] sm:$0xff] %v658_v12  ;;  %v1079_v16 = vadd.f32 %v1078_v14, %v1077_v10  ;;  %v1103_v17 = vadd.f32 %v1102_v15, %v1101_v11 }
 0x125   : > { %682 = vst [vmem:[%s1531_s4 + $0x60] sm:$0xff] %v666_v13  ;;  %v1080_v18 = vpop.f32.mrf.mxu0  ;;  %v1104_v19 = vpop.f32.mrf.mxu1 }
 0x126   : > { %v659_v20 = vmax.f32 %v1079_v16, 0.0  ;;  %v667_v21 = vmax.f32 %v1103_v17, 0.0 }
 0x127   : > { %v1081_v22 = vpop.f32.mrf.mxu0  ;;  %v1105_v23 = vpop.f32.mrf.mxu1 }
 0x128   : > { %675 = vst [vmem:[%s1531_s4 + $0x28] sm:$0xff] %v659_v20  ;;  %v1012_v24 = vpack.c.bf16 %v659_v20, %v658_v12  ;;  %683 = vst [vmem:[%s1531_s4 + $0x68] sm:$0xff] %v667_v21  ;;  %v1032_v25 = vpack.c.bf16 %v667_v21, %v666_v13  ;;  %v1082_v26 = vadd.f32 %v1081_v22, %v1080_v18 }
 0x129   : > { %v1106_v27 = vadd.f32 %v1105_v23, %v1104_v19  ;;  %v1083_v28 = vpop.f32.mrf.mxu0  ;;  %v1107_v29 = vpop.f32.mrf.mxu1 }
 0x12a   : > { %1040 = vst [vmem:[%s1538_s24 + $0x10] sm:$0xff] %v1012_v24   ;;  %1044 = vst [vmem:[%s1538_s24 + $0x30] sm:$0xff] %v1032_v25   ;;  %v660_v30 = vmax.f32 %v1082_v26, 0.0 }
 0x12b   : > { %v668_v31 = vmax.f32 %v1106_v27, 0.0  ;;  %v1084_v32 = vpop.f32.mrf.mxu0  ;;  %v1108_v33 = vpop.f32.mrf.mxu1 }
 0x12c   : > { %676 = vst [vmem:[%s1531_s4 + $0x30] sm:$0xff] %v660_v30  ;;  %v1085_v34 = vadd.f32 %v1084_v32, %v1083_v28  ;;  %v1109_v35 = vadd.f32 %v1108_v33, %v1107_v29 }
 0x12d   : > { %684 = vst [vmem:[%s1531_s4 + $0x70] sm:$0xff] %v668_v31 }
 0x12e   : > { %v661_v36 = vmax.f32 %v1085_v34, 0.0  ;;  %v669_v37 = vmax.f32 %v1109_v35, 0.0 }
 0x130   : > { %677 = vst [vmem:[%s1531_s4 + $0x38] sm:$0xff] %v661_v36  ;;  %v1017_v38 = vpack.c.bf16 %v661_v36, %v660_v30  ;;  %685 = vst [vmem:[%s1531_s4 + $0x78] sm:$0xff] %v669_v37  ;;  %v1037_v39 = vpack.c.bf16 %v669_v37, %v668_v31 }
 0x131   : > { %1273 = shalt.err (!%p1270_p7)
}
 0x132   : > { %s1274_s8 = scalar_lea.hbm %s1563_s23, 2048  ;;  %s1278_s10 = scalar_lea.hbm %s1619_s2, 4096 }
 0x133   : > { %p1275_p10 = scmp.ne.s32.totalorder %s1563_s23, %s1274_s8  ;;  %p1279_p2 = scmp.lt.s32.totalorder %s1563_s23, %s1619_s2 }
 0x134   : > { %p1280_p8 = scmp.lt.s32.totalorder %s1278_s10, %s1274_s8 }
 0x135   : > { %p1276_p4 = pnand %p1275_p10, %p1419_p9 }
 0x136   : > { %p1281_p12 = por %p1280_p8, %p1279_p2 }
 0x137   : > { %p1277_p13 = pneg %p1276_p4 }
 0x139   : > { %p1282_p0 = pnand %p1281_p12, %p1277_p13 }
 0x13b   : > { %1285 = shalt.err (!%p1282_p0)
}
 0x13c   : > { %s1346_s29 = smov 128   ;;  %s1347_s21 = smov 8   ;;  %1041 = vst [vmem:[%s1538_s24 + $0x18] sm:$0xff] %v1017_v38   ;;  %1045 = vst [vmem:[%s1538_s24 + $0x38] sm:$0xff] %v1037_v39  }
 0x13d   : > { %1128 = dma.vmem_to_hbm [thread:$0]  (%p1419_p9), %s1565_s19, 2048, %s1563_s23, %s767_s15, %s1346_s29, %s1346_s29, %s1347_s21  }
 0x13e PF: > { %s804_s22 = sand.u32 1, %s1320_s12   ;;  %p1626_p1 = scmp.ge.s32.totalorder %s1340_s17, 2 }
 0x13f   : > { %s805_s30 = scalar_lea.sflag [#allocation5], %s804_s22 }
 0x140   : > { %p1135_p3 = pnand %p1626_p1, %p1426_p11 }
 0x142   : > { %p1136_p5 = pneg %p1135_p3 }
 0x144   : > { %1315 = dma.done.wait (%p1136_p5), %s805_s30, 2048  }
 0x145   : > { %1317 = vsyncadd (%p1136_p5), %s805_s30, 4294965248  ;;  %s20_s17 = sadd.s32 1, %s1340_s17   ;;  %s1627_s12 = smov %s1324_s13 }
 0x146   : > { %p17_p6 = scmp.ge.s32.totalorder %s20_s17, 4   ;;  %s1628_s13 = smov %s1328_s14 }
 0x147   : > { %s1629_s14 = smov %s1424_s26  ;;  %s1630_s15 = smov %s1336_s16 }
 0x148   : > { %s1631_s16 = smov %s1633_s20  ;;  %19 = sbr.rel (!%p17_p6) target bundleno = 6 (0x6), region = 96 }
 0x14d   :  { %818 = vsyncpa [#allocation4], 1 }
 0x14e   :  { %820 = vsyncpa [#allocation4 + $0x1], 1 }
 0x14f   :  { %821 = vsyncpa [#allocation5], 1 }
 0x150   :  { %823 = vsyncpa [#allocation5 + $0x1], 1 }

</bundles_post_ra>
